<compile_context>
chip_gen: v7x
topology: tpu7x:2x2x1
jax: 0.10.0
libtpu: 0.0.40
codegen_flags: <defaults>
</compile_context>

<pallas_src>
import jax
import jax.numpy as jnp
from jax import lax
from jax.experimental import pallas as pl
from jax.experimental.pallas import tpu as pltpu


def _fusion_kernel(w_cls_ref, w_prg_ref, b_ref, x_cls_ref, x_prg_ref, o_ref):
    # w_cls/w_prg: (C, C); b: (C, 1); x blocks: (C, t_tile); o block: (C, t_tile)
    acc = jnp.dot(w_cls_ref[...], x_cls_ref[...],
                  preferred_element_type=jnp.float32,
                  precision=lax.Precision.HIGHEST)
    acc = acc + jnp.dot(w_prg_ref[...], x_prg_ref[...],
                        preferred_element_type=jnp.float32,
                        precision=lax.Precision.HIGHEST)
    o_ref[...] = (acc + b_ref[...]).astype(o_ref.dtype)  # bias broadcasts over lanes


def _pick_t_tile(T, max_tile=16384):
    """Full extent for small/unaligned T; else the largest multiple of 128
    <= max_tile that divides T (keeps every block lane-dense and divisible)."""
    if T <= max_tile or T % 128 != 0:
        return T
    t = max_tile - (max_tile % 128)
    while t >= 128:
        if T % t == 0:
            return t
        t -= 128
    return T


def probability_progress_fusion(in_cls, in_prg, weight, bias):
    """in_cls, in_prg: (N, C, T) float32; weight: (C, 2C); bias: (C,)."""
    N, C, T = in_cls.shape
    assert in_prg.shape == (N, C, T)
    assert weight.shape == (C, 2 * C)
    assert bias.shape == (C,)

    # Fold torch.cat((in_cls, in_prg), dim=1) into a weight split (tiny copies).
    w_cls = weight[:, :C]                      # (C, C)
    w_prg = weight[:, C:]                      # (C, C)
    b2d = bias.reshape(C, 1)                   # (C, 1) for lane broadcast

    t_tile = _pick_t_tile(T)
    grid = (N, T // t_tile)

    return pl.pallas_call(
        _fusion_kernel,
        out_shape=jax.ShapeDtypeStruct((N, C, T), in_cls.dtype),
        grid_spec=pltpu.PrefetchScalarGridSpec(
            num_scalar_prefetch=0,
            grid=grid,
            in_specs=[
                pl.BlockSpec((C, C), lambda n, j: (0, 0)),            # W_cls
                pl.BlockSpec((C, C), lambda n, j: (0, 0)),            # W_prg
                pl.BlockSpec((C, 1), lambda n, j: (0, 0)),            # bias
                pl.BlockSpec((None, C, t_tile), lambda n, j: (n, 0, j)),  # in_cls
                pl.BlockSpec((None, C, t_tile), lambda n, j: (n, 0, j)),  # in_prg
            ],
            out_specs=pl.BlockSpec((None, C, t_tile), lambda n, j: (n, 0, j)),
        ),
        compiler_params=pltpu.CompilerParams(
            dimension_semantics=("parallel", "parallel")),
    )(w_cls, w_prg, b2d, in_cls, in_prg)


if __name__ == "__main__":
    # Small shapes consistent with the module: batch=2, num_classes=4, seq=16
    N, C, T = 2, 4, 16
    key = jax.random.PRNGKey(0)
    k1, k2, k3, k4 = jax.random.split(key, 4)

    in_cls = jax.random.normal(k1, (N, C, T), dtype=jnp.float32)
    in_prg = jax.random.normal(k2, (N, C, T), dtype=jnp.float32)

    # Deterministic parameter init (Conv1d weight (C, 2C, 1) -> squeeze k dim).
    weight = jax.random.normal(k3, (C, 2 * C), dtype=jnp.float32) * 0.1
    bias = jax.random.normal(k4, (C,), dtype=jnp.float32) * 0.1

    out = probability_progress_fusion(in_cls, in_prg, weight, bias)
    out = jax.block_until_ready(out)

    # Pure-JAX reference of the same cat + 1x1 conv.
    x_concat = jnp.concatenate([in_cls, in_prg], axis=1)        # (N, 2C, T)
    ref = jnp.einsum("oi,nit->not", weight, x_concat,
                     precision=lax.Precision.HIGHEST) + bias[None, :, None]
    assert out.shape == (N, C, T)
    assert jnp.allclose(out, ref, atol=1e-5, rtol=1e-5)

    print("KERNEL_OK")
</pallas_src>

<mosaic_0001>
module attributes {stable_mosaic.version = 11 : i64} {
  func.func @_fusion_kernel(%arg0: i32, %arg1: i32, %arg2: memref<4x4xf32, #tpu.memory_space<vmem>>, %arg3: memref<4x4xf32, #tpu.memory_space<vmem>>, %arg4: memref<4x1xf32, #tpu.memory_space<vmem>>, %arg5: memref<1x4x16xf32, #tpu.memory_space<vmem>>, %arg6: memref<1x4x16xf32, #tpu.memory_space<vmem>>, %arg7: memref<1x4x16xf32, #tpu.memory_space<vmem>>) attributes {dimension_semantics = [#tpu.dimension_semantics<parallel>, #tpu.dimension_semantics<parallel>], iteration_bounds = array<i64: 2, 1>, scalar_prefetch = 0 : i64, scratch_operands = 0 : i64, tpu.core_type = #tpu.core_type<tc>, window_params = [{pipeline_mode = #tpu.pipeline_mode<synchronous>, transform_indices = @transform_0, window_bounds = array<i64: 4, 4>}, {pipeline_mode = #tpu.pipeline_mode<synchronous>, transform_indices = @transform_1, window_bounds = array<i64: 4, 4>}, {pipeline_mode = #tpu.pipeline_mode<synchronous>, transform_indices = @transform_2, window_bounds = array<i64: 4, 1>}, {transform_indices = @transform_3, window_bounds = array<i64: 1, 4, 16>}, {transform_indices = @transform_4, window_bounds = array<i64: 1, 4, 16>}, {transform_indices = @transform_5, window_bounds = array<i64: 1, 4, 16>}]} {
    %c0 = arith.constant 0 : index
    %c0_0 = arith.constant 0 : index
    %0 = vector.load %arg2[%c0, %c0_0] : memref<4x4xf32, #tpu.memory_space<vmem>>, vector<4x4xf32>
    %c0_1 = arith.constant 0 : index
    %c0_2 = arith.constant 0 : index
    %c0_3 = arith.constant 0 : index
    %1 = vector.load %arg5[%c0_1, %c0_2, %c0_3] : memref<1x4x16xf32, #tpu.memory_space<vmem>>, vector<1x4x16xf32>
    %2 = vector.shape_cast %1 : vector<1x4x16xf32> to vector<4x16xf32>
    %cst = arith.constant dense<0.000000e+00> : vector<4x16xf32>
    %3 = tpu.matmul %0, %2, %cst {dimension_numbers = #tpu.dot_dimension_numbers<[1], [0], [0], [1], [0, 0, 1, 1], [], []>, precision = #tpu.contract_precision<fp32>} : vector<4x4xf32>, vector<4x16xf32>, vector<4x16xf32> -> vector<4x16xf32>
    %c0_4 = arith.constant 0 : index
    %c0_5 = arith.constant 0 : index
    %4 = vector.load %arg3[%c0_4, %c0_5] : memref<4x4xf32, #tpu.memory_space<vmem>>, vector<4x4xf32>
    %c0_6 = arith.constant 0 : index
    %c0_7 = arith.constant 0 : index
    %c0_8 = arith.constant 0 : index
    %5 = vector.load %arg6[%c0_6, %c0_7, %c0_8] : memref<1x4x16xf32, #tpu.memory_space<vmem>>, vector<1x4x16xf32>
    %6 = vector.shape_cast %5 : vector<1x4x16xf32> to vector<4x16xf32>
    %cst_9 = arith.constant dense<0.000000e+00> : vector<4x16xf32>
    %7 = tpu.matmul %4, %6, %cst_9 {dimension_numbers = #tpu.dot_dimension_numbers<[1], [0], [0], [1], [0, 0, 1, 1], [], []>, precision = #tpu.contract_precision<fp32>} : vector<4x4xf32>, vector<4x16xf32>, vector<4x16xf32> -> vector<4x16xf32>
    %8 = arith.addf %3, %7 : vector<4x16xf32>
    %c0_10 = arith.constant 0 : index
    %c0_11 = arith.constant 0 : index
    %9 = vector.load %arg4[%c0_10, %c0_11] : memref<4x1xf32, #tpu.memory_space<vmem>>, vector<4x1xf32>
    %10 = vector.broadcast %9 : vector<4x1xf32> to vector<4x16xf32>
    %11 = arith.addf %8, %10 : vector<4x16xf32>
    %c0_12 = arith.constant 0 : index
    %c0_13 = arith.constant 0 : index
    %c0_14 = arith.constant 0 : index
    %12 = vector.load %arg7[%c0_12, %c0_13, %c0_14] : memref<1x4x16xf32, #tpu.memory_space<vmem>>, vector<1x4x16xf32>
    %13 = vector.shape_cast %12 : vector<1x4x16xf32> to vector<4x16xf32>
    %14 = vector.shape_cast %11 : vector<4x16xf32> to vector<1x4x16xf32>
    tpu.vector_store %arg7[%c0_12, %c0_13, %c0_14], %14 {strides = array<i32>} : memref<1x4x16xf32, #tpu.memory_space<vmem>>, vector<1x4x16xf32>,
    return
  }
  func.func @transform_0(%arg0: i32, %arg1: i32) -> (i32, i32) {
    %c0_i32 = arith.constant 0 : i32
    %c0_i32_0 = arith.constant 0 : i32
    %c0_i32_1 = arith.constant 0 : i32
    return %c0_i32, %c0_i32_0 : i32, i32
  }
  func.func @transform_1(%arg0: i32, %arg1: i32) -> (i32, i32) {
    %c0_i32 = arith.constant 0 : i32
    %c0_i32_0 = arith.constant 0 : i32
    %c0_i32_1 = arith.constant 0 : i32
    return %c0_i32, %c0_i32_0 : i32, i32
  }
  func.func @transform_2(%arg0: i32, %arg1: i32) -> (i32, i32) {
    %c0_i32 = arith.constant 0 : i32
    %c0_i32_0 = arith.constant 0 : i32
    %c0_i32_1 = arith.constant 0 : i32
    return %c0_i32, %c0_i32_0 : i32, i32
  }
  func.func @transform_3(%arg0: i32, %arg1: i32) -> (i32, i32, i32) {
    %c0_i32 = arith.constant 0 : i32
    %c0_i32_0 = arith.constant 0 : i32
    return %arg0, %c0_i32, %arg1 : i32, i32, i32
  }
  func.func @transform_4(%arg0: i32, %arg1: i32) -> (i32, i32, i32) {
    %c0_i32 = arith.constant 0 : i32
    %c0_i32_0 = arith.constant 0 : i32
    return %arg0, %c0_i32, %arg1 : i32, i32, i32
  }
  func.func @transform_5(%arg0: i32, %arg1: i32) -> (i32, i32, i32) {
    %c0_i32 = arith.constant 0 : i32
    %c0_i32_0 = arith.constant 0 : i32
    return %arg0, %c0_i32, %arg1 : i32, i32, i32
  }
}

</mosaic_0001>

<bundles_post_ra>
// kernel: tpu_custom_call.1
= control target key start
LH: loop header
LB: loop body
LE: loop exit
PB: predicated region body
PF: predicated region fallthrough
CT: control target
= control target key end

     0   :  { %10 = vsyncpa [#allocation3], 0  ;;  %s1930_s0 = inlined_call_operand.hbm [shape: f32[4,4], index: 0, kind: input, shape index: {}]   ;;  %s1931_s1 = inlined_call_operand.hbm [shape: f32[4,4], index: 1, kind: input, shape index: {}]   ;;  %s1932_s2 = inlined_call_operand.vmem [shape: f32[4,1], index: 2, kind: input, shape index: {}]   ;;  %s1933_s3 = inlined_call_operand.vmem [shape: f32[2,4,16], index: 3, kind: input, shape index: {}]   ;;  %s1934_s4 = inlined_call_operand.vmem [shape: f32[2,4,16], index: 4, kind: input, shape index: {}]   ;;  %s1935_s5 = inlined_call_operand.hbm [shape: f32[2,4,16], index: 5, kind: output, shape index: {}]  }
   0x1   :  { %11 = vsyncpa [#allocation6], 0 }
   0x2   :  { %12 = vsyncpa [#allocation4], 0 }
   0x3   :  { %14 = vsyncpa [#allocation4 + $0x1], 0  ;;  %s1701_s18 = smov 0   ;;  %s1703_s19 = smov 0  }
   0x4   :  { %s1705_s20 = smov 0   ;;  %s1707_s21 = smov 0  }
   0x5   :  { %s1709_s22 = smov 0   ;;  %s1711_s23 = smov 0  }
   0x6 LB: > { %s1341_s24 = sadd.s32 4294967295, %s1663_s23   ;;  %s1342_s25 = sadd.s32 4294967294, %s1663_s23   ;;  %s1663_s23 = sphi %s1711_s23, %s20_s23   ;;  %s1659_s22 = sphi %s1709_s22, %s1953_s22   ;;  %s1655_s21 = sphi %s1707_s21, %s1952_s21   ;;  %s1651_s20 = sphi %s1705_s20, %s1951_s20   ;;  %s1647_s19 = sphi %s1703_s19, %s1950_s19   ;;  %s1643_s18 = sphi %s1701_s18, %s1949_s18  }
   0x7   : > { %s32_s26 = sadd.s32 1, %s1659_s22  ;;  %s160_s27 = sadd.s32 1, %s1651_s20 }
   0x8   : > { %p34_p0 = scmp.ge.s32.totalorder %s32_s26, 2  ;;  %p170_p1 = scmp.ne.s32.totalorder %s1651_s20, %s1647_s19 }
   0x9   : > { %p171_p2 = scmp.eq.s32.totalorder %s1341_s24, 1  ;;  %p176_p3 = scmp.ne.s32.totalorder %s1647_s19, %s1643_s18 }
   0xa   : > { %s1955_s26 = smov (%p34_p0, %s32_s26), 0  ;;  %p177_p5 = scmp.eq.s32.totalorder %s1342_s25, 1 }
   0xb   : > { %p1741_p4 = por %p171_p2, %p170_p1  ;;  %s155_s29 = ssub.s32 %s1659_s22, %s1955_s26 }
   0xc   : > { %p1343_p6 = scmp.ge.s32.totalorder %s1663_s23, 1  ;;  %p158_p7 = scmp.eq.s32.totalorder %s155_s29, 0 }
   0xd   : > { %s1940_s28 = scalar_select %p1741_p4, 1, 0 }
   0xe   : > { %p1748_p8 = por %p177_p5, %p176_p3  ;;  %p184_p9 = scmp.lt.s32.totalorder %s1663_s23, 3 }
   0xf   : > { %s1754_s6 = scalar_select %p158_p7, %s1651_s20, %s160_s27  }
  0x10   : > { %s1941_s30 = scalar_select %p1748_p8, 1, 0 }
  0x11   : > { %p1756_p10 = pnand %p1343_p6, %p184_p9  ;;  %p1760_p11 = scmp.eq.s32.totalorder %s1341_s24, 0 }
  0x12   : > { %s1665_s9 = smov [#allocation2]   ;;  %s1666_s11 = smov [#allocation5]  }
  0x13   : > { %s1942_s7 = scalar_select %p1756_p10, 1, 0 }
  0x14   : > { %s1943_s8 = scalar_select %p1760_p11, 1, 0 }
  0x15   : > { %p1451_p12 = pneg %p1756_p10  ;;  %s197_s10 = sshll.u32 %s1665_s9, 4  ;;  %s198_s10 = int_to_ptr.vmem [resolvable:$true] %s197_s10 }
  0x16   : > { %s208_s12 = sshll.u32 %s1666_s11, 4  ;;  %s1521_s16 = scalar_lea.hbm %s1930_s0, 64  ;;  %s1772_s12 = int_to_ptr.vmem [resolvable:$true] %s208_s12 }
  0x17   : > { %p1768_p13 = pnand %p1760_p11, %p1451_p12  ;;  %p1522_p0 = scmp.ne.s32.totalorder %s1930_s0, %s1521_s16 }
  0x18   : > { %p1528_p5 = scmp.lt.u32.totalorder %s1521_s16, %s1930_s0 }
  0x19   : > { %p1523_p1 = pneg %p1768_p13 }
  0x1b   : > { %p1524_p2 = pnand %p1523_p1, %p1522_p0 }
  0x1d   : > { %p1525_p3 = pneg %p1524_p2 }
  0x1f   : > { %p1530_p6 = pnand %p1528_p5, %p1525_p3 }
  0x21   : > { %1533 = shalt.err (!%p1530_p6)
}
  0x22   : > { %s1534_s29 = scalar_lea.vmem %s198_s10, 64  ;;  %p1542_p8 = scmp.lt.s32.totalorder %s198_s10, %s198_s10 }
  0x23   : > { %p1535_p7 = scmp.ne.s32.totalorder %s198_s10, %s1534_s29  ;;  %p1543_p4 = scmp.lt.s32.totalorder %s1534_s29, %s1534_s29 }
  0x25   : > { %p1537_p9 = pnand %p1535_p7, %p1523_p1  ;;  %p1544_p11 = por %p1543_p4, %p1542_p8 }
  0x27   : > { %p1538_p12 = pneg %p1537_p9 }
  0x29   : > { %p1545_p10 = pnand %p1544_p11, %p1538_p12 }
  0x2b   : > { %1548 = shalt.err (!%p1545_p10)
}
  0x2c   : > { %1454 = dma.hbm_to_vmem [thread:$0]  (!%p1768_p13), %s1930_s0, 64, %s198_s10, [#allocation3]  }
  0x2d   : > { %s1549_s16 = scalar_lea.hbm %s1931_s1, 64 }
  0x2e   : > { %p1550_p0 = scmp.ne.s32.totalorder %s1931_s1, %s1549_s16  ;;  %p1556_p10 = scmp.lt.u32.totalorder %s1549_s16, %s1931_s1 }
  0x30   : > { %p1552_p4 = pnand %p1550_p0, %p1523_p1 }
  0x32   : > { %p1553_p8 = pneg %p1552_p4 }
  0x34   : > { %p1558_p11 = pnand %p1556_p10, %p1553_p8 }
  0x36   : > { %1561 = shalt.err (!%p1558_p11)
}
  0x37   : > { %s1562_s10 = scalar_lea.vmem %s1772_s12, 64  ;;  %p1570_p6 = scmp.lt.s32.totalorder %s1772_s12, %s1772_s12 }
  0x38   : > { %p1563_p2 = scmp.ne.s32.totalorder %s1772_s12, %s1562_s10  ;;  %p1571_p7 = scmp.lt.s32.totalorder %s1562_s10, %s1562_s10 }
  0x3a   : > { %p1565_p3 = pnand %p1563_p2, %p1523_p1  ;;  %p1572_p9 = por %p1571_p7, %p1570_p6 }
  0x3c   : > { %p1566_p5 = pneg %p1565_p3 }
  0x3e   : > { %p1573_p12 = pnand %p1572_p9, %p1566_p5 }
  0x40   : > { %1576 = shalt.err (!%p1573_p12)
}
  0x41   : > { %1457 = dma.hbm_to_vmem [thread:$0]  (!%p1768_p13), %s1931_s1, 64, %s1772_s12, [#allocation6]  }
  0x42   : > { %p1945_p0 = scmp.ne.s32.totalorder %s1942_s7, 0 }
  0x43   : > { %p1946_p4 = scmp.ne.s32.totalorder (!%p1945_p0), %s1943_s8, 0 }
  0x44   : > { %244 = sbr.rel (%p1945_p0) target bundleno = 347 (0x15b), region = 40 }
  0x4b   : > { %1630 = dma.done.wait (%p1946_p4), [#allocation3], 64  }
  0x4c   : > { %1632 = vsyncadd (%p1946_p4), [#allocation3], 4294967232 }
  0x4d   : > { %1634 = dma.done.wait (%p1946_p4), [#allocation6], 64  }
  0x4e   : > { %1636 = vsyncadd (%p1946_p4), [#allocation6], 4294967232  ;;  %p285_p1 = scmp.lt.s32.totalorder %s1655_s21, 1  ;;  %v1667_v0 = vmov 0.0   ;;  %vm1668_vm0 = vmmov 0   ;;  %v1669_v1 = vmov 0  }
  0x4f   : > { %1381 = vmatprep.subr.mxu0 %v1667_v0  ;;  %1383 = vmatprep.mubr.msk.f32.mxu0 %vm1668_vm0, %v1667_v0  ;;  %vm307_vm1 = vcmask 1043456   ;;  %vm303_vm2 = vcmask 31744   ;;  %v299_v3 = vld [vmem:[#allocation2] sm:$0xf]  ;;  %v301_v4 = vld [vmem:[#allocation5] sm:$0xf] }
  0x50   : > { %s286_s7 = scalar_select %p285_p1, %s1655_s21, 1  ;;  %1386 = vmatprep.subr.mxu1 %v1667_v0  ;;  %1388 = vmatprep.mubr.msk.f32.mxu1 %vm1668_vm0, %v1667_v0  ;;  %v305_v6 = vsel %vm303_vm2, %v301_v4, 0  ;;  %v758_v7 = vsel %vm303_vm2, %v299_v3, 0  ;;  %v1209_v12 = vld [vmem:[%s1932_s2] sm:$0xf]  ;;  %vm1216_vm3 = vcmask 125952  }
  0x51   : > { %1520 = vset.pattern.permute.xlu0 %v1669_v1  ;;  %v377_v10 = vand.u32 4294901760, %v305_v6  ;;  %v829_v15 = vand.u32 4294901760, %v758_v7  ;;  %s282_s25 = sand.u32 1, %s1647_s19   ;;  %s1354_s10 = sshll.u32 %s1655_s21, 6 }
  0x52   : > { %s1351_s8 = sshll.u32 %s286_s7, 2  ;;  %1212 = vperm.xlu0 %1520, %v1209_v12   ;;  %s1350_s27 = sshll.u32 %s282_s25, 2 }
  0x53   : > { %s298_s11 = scalar_lea.vmem %s1934_s4, %s1351_s8  ;;  %s291_s16 = scalar_lea.vmem %s1933_s3, %s1351_s8  ;;  %v378_v14 = vsub.f32 %v305_v6, %v377_v10  ;;  %v830_v22 = vsub.f32 %v758_v7, %v829_v15 }
  0x54   : > { %v302_v2 = vld [vmem:[%s298_s11] sm:$0xf]  ;;  %s284_s29 = scalar_lea.vmem [#allocation7], %s1350_s27  ;;  %s1883_s12 = scalar_lea.hbm %s1935_s5, %s1354_s10 }
  0x55   : > { %v309_v5 = vsel %vm307_vm1, %v302_v2, 0  ;;  %v300_v8 = vld [vmem:[%s291_s16] sm:$0xf]  ;;  %v379_v17 = vand.u32 4294901760, %v378_v14  ;;  %v831_v26 = vand.u32 4294901760, %v830_v22  ;;  %s1233_s9 = sshll.u32 %s284_s29, 4  ;;  %s1885_s9 = int_to_ptr.vmem [resolvable:$true] %s1233_s9 }
  0x56   : > { %v312_v9 = vand.u32 4294901760, %v309_v5  ;;  %v761_v11 = vsel %vm307_vm1, %v300_v8, 0  ;;  %s1219_s13 = scalar_lea.sflag [#allocation4], %s282_s25  ;;  %s1577_s11 = scalar_lea.vmem %s1885_s9, 64 }
  0x57   : > { %v764_v13 = vand.u32 4294901760, %v761_v11  ;;  %v380_v20 = vsub.f32 %v378_v14, %v379_v17  ;;  %v832_v28 = vsub.f32 %v830_v22, %v831_v26  ;;  %p1578_p13 = scmp.ne.s32.totalorder %s1885_s9, %s1577_s11  ;;  %p1947_p8 = scmp.ne.s32.totalorder %s1940_s28, 0 }
  0x58   : > { %1382 = vmatpush3.msra.mxu0 %v312_v9  ;;  %v389_v16 = vsub.f32 %v309_v5, %v312_v9  ;;  %s1670_s21 = smov [#allocation7]  }
  0x59   : > { %1391 = vmatprep.subr.mxu0 %v1667_v0  ;;  %v841_v19 = vsub.f32 %v761_v11, %v764_v13  ;;  %v381_v23 = vand.u32 4294901760, %v380_v20  ;;  %v833_v30 = vand.u32 4294901760, %v832_v28  ;;  %p1579_p10 = pnand %p1578_p13, %p1947_p8  ;;  %s1581_s14 = sshll.u32 %s1670_s21, 4  ;;  %s1582_s14 = int_to_ptr.vmem [resolvable:$false] %s1581_s14 }
  0x5a   : > { %v390_v18 = vand.u32 4294901760, %v389_v16  ;;  %s1583_s15 = scalar_lea.vmem %s1582_s14, 128  ;;  %p1584_p2 = scmp.lt.s32.totalorder %s1885_s9, %s1582_s14 }
  0x5b   : > { %v842_v25 = vand.u32 4294901760, %v841_v19  ;;  %1384 = vmatmul.mubr.f32.vlgmr.msra.gmra.mrb[0].mxu0 %v381_v23  ;;  %p1580_p11 = pneg %p1579_p10  ;;  %p1585_p3 = scmp.lt.s32.totalorder %s1583_s15, %s1577_s11 }
  0x5c   : > { %v391_v21 = vsub.f32 %v389_v16, %v390_v18  ;;  %1392 = vmatpush3.msra.mxu0 %v389_v16  ;;  %1393 = vmatprep.mubr.msk.f32.mxu0 %vm1668_vm0, %v1667_v0 }
  0x5d   : > { %1401 = vmatprep.subr.mxu0 %v1667_v0  ;;  %v843_v27 = vsub.f32 %v841_v19, %v842_v25  ;;  %p1586_p5 = por %p1585_p3, %p1584_p2 }
  0x5e   : > { %v392_v24 = vand.u32 4294901760, %v391_v21 }
  0x5f   : > { %1394 = vmatmul.mubr.f32.vlgmr.msra.gmra.mrb[2].mxu0 %v378_v14  ;;  %v844_v29 = vand.u32 4294901760, %v843_v27  ;;  %p1587_p6 = pnand %p1586_p5, %p1580_p11 }
  0x60   : > { %1387 = vmatpush3.msra.mxu1 %v392_v24  ;;  %1402 = vmatpush3.msra.mxu0 %v390_v18 }
  0x61   : > { %1389 = vmatmul.mubr.f32.vlgmr.msra.gmra.mrb[0].mxu1 %v377_v10  ;;  %1396 = vmatprep.subr.mxu1 %v1667_v0 }
  0x62   : > { %1397 = vmatpush3.msra.mxu1 %v312_v9  ;;  %1398 = vmatprep.mubr.msk.f32.mxu1 %vm1668_vm0, %v1667_v0 }
  0x63   : > { %1406 = vmatprep.subr.mxu1 %v1667_v0  ;;  %1403 = vmatprep.mubr.msk.f32.mxu0 %vm1668_vm0, %v1667_v0 }
  0x64   : > { %1411 = vmatprep.subr.mxu0 %v1667_v0  ;;  %1404 = vmatmul.mubr.f32.vlgmr.msra.gmra.mrb[4].mxu0 %v377_v10 }
  0x65   : > { %1399 = vmatmul.mubr.f32.vlgmr.msra.gmra.mrb[2].mxu1 %v379_v17  ;;  %1412 = vmatpush3.msra.mxu0 %v764_v13 }
  0x66   : > { %1407 = vmatpush3.msra.mxu1 %v312_v9  ;;  %1408 = vmatprep.mubr.msk.f32.mxu1 %vm1668_vm0, %v1667_v0 }
  0x67   : > { %1416 = vmatprep.subr.mxu1 %v1667_v0  ;;  %1413 = vmatprep.mubr.msk.f32.mxu0 %vm1668_vm0, %v1667_v0 }
  0x68   : > { %1421 = vmatprep.subr.mxu0 %v1667_v0  ;;  %1414 = vmatmul.mubr.f32.vlgmr.msra.gmra.mrb[6].mxu0 %v833_v30 }
  0x69   : > { %1409 = vmatmul.mubr.f32.vlgmr.msra.gmra.mrb[4].mxu1 %v377_v10  ;;  %1422 = vmatpush3.msra.mxu0 %v841_v19 }
  0x6a   : > { %1417 = vmatpush3.msra.mxu1 %v844_v29  ;;  %1418 = vmatprep.mubr.msk.f32.mxu1 %vm1668_vm0, %v1667_v0 }
  0x6b   : > { %1426 = vmatprep.subr.mxu1 %v1667_v0  ;;  %1423 = vmatprep.mubr.msk.f32.mxu0 %vm1668_vm0, %v1667_v0 }
  0x6c   : > { %1431 = vmatprep.subr.mxu0 %v1667_v0  ;;  %1424 = vmatmul.mubr.f32.vlgmr.msra.gmra.mrb[8].mxu0 %v830_v22 }
  0x6d   : > { %1419 = vmatmul.mubr.f32.vlgmr.msra.gmra.mrb[6].mxu1 %v829_v15  ;;  %1432 = vmatpush3.msra.mxu0 %v842_v25 }
  0x6e   : > { %1427 = vmatpush3.msra.mxu1 %v764_v13  ;;  %1428 = vmatprep.mubr.msk.f32.mxu1 %vm1668_vm0, %v1667_v0 }
  0x6f   : > { %1436 = vmatprep.subr.mxu1 %v1667_v0  ;;  %1433 = vmatprep.mubr.msk.f32.mxu0 %vm1668_vm0, %v1667_v0 }
  0x70   : > { %1434 = vmatmul.mubr.f32.vlgmr.msra.gmra.mrb[10].mxu0 %v829_v15 }
  0x71   : > { %1429 = vmatmul.mubr.f32.vlgmr.msra.gmra.mrb[8].mxu1 %v831_v26 }
  0x72   : > { %1437 = vmatpush3.msra.mxu1 %v764_v13  ;;  %1438 = vmatprep.mubr.msk.f32.mxu1 %vm1668_vm0, %v1667_v0 }
  0x75   : > { %1439 = vmatmul.mubr.f32.vlgmr.msra.gmra.mrb[10].mxu1 %v829_v15 }
  0xd1   : > { %v1213_v1 = vpop.permute.xlu0 %1212 }
 0x12e   : > { %v383_v31 = vpop.f32.mrb[0].mxu0 }
 0x12f   : > { %v1385_v32 = vpop.f32.mrb[1].mxu0 }
 0x132   : > { %v533_v36 = vpop.f32.mrb[2].mxu0 }
 0x133   : > { %v1395_v38 = vpop.f32.mrb[3].mxu0 }
 0x134   : > { %v459_v33 = vpop.f32.mrb[0].mxu1 }
 0x135   : > { %v460_v34 = vadd.f32 %v459_v33, %v383_v31  ;;  %v1390_v35 = vpop.f32.mrb[1].mxu1 }
 0x137   : > { %v534_v37 = vadd.f32 %v533_v36, %v460_v34  ;;  %v681_v42 = vpop.f32.mrb[4].mxu0 }
 0x138   : > { %v607_v39 = vpop.f32.mrb[2].mxu1  ;;  %v1405_v44 = vpop.f32.mrb[5].mxu0 }
 0x139   : > { %v1400_v40 = vpop.f32.mrb[3].mxu1  ;;  %v608_v41 = vadd.f32 %v607_v39, %v534_v37 }
 0x13b   : > { %v682_v43 = vadd.f32 %v681_v42, %v608_v41  ;;  %v835_v48 = vpop.f32.mrb[6].mxu0 }
 0x13c   : > { %v753_v45 = vpop.f32.mrb[4].mxu1  ;;  %v1415_v50 = vpop.f32.mrb[7].mxu0 }
 0x13d   : > { %v1410_v46 = vpop.f32.mrb[5].mxu1  ;;  %v754_v47 = vadd.f32 %v753_v45, %v682_v43 }
 0x13f   : > { %v836_v49 = vadd.f32 %v835_v48, %v754_v47  ;;  %v985_v54 = vpop.f32.mrb[8].mxu0 }
 0x140   : > { %v911_v51 = vpop.f32.mrb[6].mxu1  ;;  %v1425_v56 = vpop.f32.mrb[9].mxu0 }
 0x141   : > { %v1420_v52 = vpop.f32.mrb[7].mxu1  ;;  %v912_v53 = vadd.f32 %v911_v51, %v836_v49 }
 0x143   : > { %v986_v55 = vadd.f32 %v985_v54, %v912_v53  ;;  %v1133_v60 = vpop.f32.mrb[10].mxu0 }
 0x144   : > { %v1059_v57 = vpop.f32.mrb[8].mxu1  ;;  %v1435_v62 = vpop.f32.mrb[11].mxu0 }
 0x145   : > { %v1430_v58 = vpop.f32.mrb[9].mxu1  ;;  %v1060_v59 = vadd.f32 %v1059_v57, %v986_v55 }
 0x147   : > { %v1134_v61 = vadd.f32 %v1133_v60, %v1060_v59 }
 0x148   : > { %v1205_v63 = vpop.f32.mrb[10].mxu1 }
 0x149   : > { %v1440_v0 = vpop.f32.mrb[11].mxu1  ;;  %v1206_v2 = vadd.f32 %v1205_v63, %v1134_v61 }
 0x14b   : > { %v1215_v3 = vadd.f32 %v1213_v1, %v1206_v2 }
 0x14d   : > { %1217 = vst.msk [vmem:[%s284_s29] sm:$0xf] %vm1216_vm3, %v1215_v3 }
 0x14e   : > { %1590 = shalt.err (!%p1587_p6)
}
 0x14f   : > { %s1591_s16 = scalar_lea.hbm %s1883_s12, 64  ;;  %s1595_s25 = scalar_lea.hbm %s1935_s5, 128 }
 0x150   : > { %p1592_p7 = scmp.ne.s32.totalorder %s1883_s12, %s1591_s16  ;;  %p1596_p0 = scmp.lt.u32.totalorder %s1883_s12, %s1935_s5 }
 0x151   : > { %p1597_p4 = scmp.lt.u32.totalorder %s1595_s25, %s1591_s16  ;;  %p1599_p13 = scmp.lt.u32.totalorder %s1591_s16, %s1883_s12 }
 0x152   : > { %p1593_p9 = pnand %p1592_p7, %p1947_p8 }
 0x153   : > { %p1598_p1 = por %p1597_p4, %p1596_p0 }
 0x154   : > { %p1594_p12 = pneg %p1593_p9 }
 0x155   : > { %p1600_p10 = por %p1599_p13, %p1598_p1 }
 0x157   : > { %p1601_p11 = pnand %p1600_p10, %p1594_p12 }
 0x159   : > { %1604 = shalt.err (!%p1601_p11)
}
 0x15a   : > { %1449 = dma.vmem_to_hbm [thread:$0]  (%p1947_p8), %s1885_s9, 64, %s1883_s12, %s1219_s13  }
 0x15b PF: > { %p1466_p2 = scmp.ge.s32.totalorder %s1663_s23, 2  ;;  %s1245_s29 = sand.u32 1, %s1643_s18  }
 0x15c   : > { %p1948_p3 = scmp.ne.s32.totalorder %s1941_s30, 0  ;;  %s1246_s7 = scalar_lea.sflag [#allocation4], %s1245_s29 }
 0x15e   : > { %p1459_p5 = pnand %p1466_p2, %p1948_p3 }
 0x160   : > { %1638 = dma.done.wait (!%p1459_p5), %s1246_s7, 64  }
 0x161   : > { %1640 = vsyncadd (!%p1459_p5), %s1246_s7, 4294967232  ;;  %s20_s23 = sadd.s32 1, %s1663_s23   ;;  %s1949_s18 = smov %s1647_s19 }
 0x162   : > { %p17_p6 = scmp.ge.s32.totalorder %s20_s23, 4   ;;  %s1950_s19 = smov %s1651_s20 }
 0x163   : > { %s1951_s20 = smov %s1754_s6  ;;  %s1952_s21 = smov %s1659_s22 }
 0x164   : > { %s1953_s22 = smov %s1955_s26  ;;  %19 = sbr.rel (!%p17_p6) target bundleno = 6 (0x6), region = 87 }
 0x16b   :  { %1251 = vsyncpa [#allocation3], 1 }
 0x16c   :  { %1253 = vsyncpa [#allocation3 + $0x1], 1 }
 0x16d   :  { %1254 = vsyncpa [#allocation6], 1 }
 0x16e   :  { %1255 = vsyncpa [#allocation4], 1 }
 0x16f   :  { %1257 = vsyncpa [#allocation4 + $0x1], 1 }

</bundles_post_ra>
